<compile_context>
chip_gen: v7x
topology: tpu7x:2x2x1
jax: 0.10.0
libtpu: 0.0.40
codegen_flags: <defaults>
</compile_context>

<pallas_src>
import jax
import jax.numpy as jnp
from jax.experimental import pallas as pl
from jax.experimental.pallas import tpu as pltpu


def _learned_softplus_kernel(scalars_ref, x_ref, o_ref):
    # scalars_ref is a (1, 2) f32 SMEM buffer: [beta, 1/beta].
    beta = scalars_ref[0, 0]
    inv_beta = scalars_ref[0, 1]

    x = x_ref[...]
    xf = x.astype(jnp.float32)
    beta_x = beta * xf
    # exp(beta_x) may overflow to +inf for large beta_x, but those lanes are
    # replaced by x in the where(), matching the PyTorch reference.
    soft = jnp.log1p(jnp.exp(beta_x)) * inv_beta
    o_ref[...] = jnp.where(beta_x < 20.0, soft, xf).astype(o_ref.dtype)


_LANE_CANDIDATES = (8192, 4096, 2048, 1024, 512, 256, 128)


def _choose_layout(n, itemsize, sub_mult):
    """Pick a (lanes, rows) factorization of n: lanes % 128 == 0, widest first."""
    # Prefer layouts whose row count keeps full (sub_mult, 128) tiles.
    for lanes in _LANE_CANDIDATES:
        if n % lanes == 0 and (n // lanes) % sub_mult == 0:
            return lanes, n // lanes
    # Otherwise accept any factorization small enough to be one full block
    # (full-extent blocks are exempt from the (8,128) divisibility rule).
    for lanes in _LANE_CANDIDATES:
        if n % lanes == 0 and n * itemsize <= 4 * 1024 * 1024:
            return lanes, n // lanes
    return None


def learned_softplus(x, log_beta, *, target_block_bytes=2 * 1024 * 1024):
    """Elementwise learned softplus.

    x:        any-shape float array (NCHW expected from the PyTorch module).
    log_beta: scalar parameter (log of beta).
    """
    orig_shape = x.shape
    dtype = x.dtype
    n = x.size
    itemsize = jnp.dtype(dtype).itemsize
    # Sublane multiple required for packed dtypes (f32:8, bf16:16, int8/fp8:32).
    sub_mult = {4: 8, 2: 16, 1: 32}.get(itemsize, 8)

    flat = x.reshape(-1)
    padded_n = n
    layout = _choose_layout(n, itemsize, sub_mult)
    if layout is None:
        # Ragged element count: pad to the minimal (sub_mult * 128) multiple.
        # TODO(synk): in-kernel masking of the ragged tail would avoid this
        # extra HBM pass; only hit when numel is not a multiple of 128.
        quantum = sub_mult * 128
        padded_n = ((n + quantum - 1) // quantum) * quantum
        flat = jnp.pad(flat, (0, padded_n - n))
        layout = _choose_layout(padded_n, itemsize, sub_mult)
    lanes, rows = layout
    x2d = flat.reshape(rows, lanes)

    # Choose block rows: ~target_block_bytes per buffer, multiple of sub_mult,
    # and an exact divisor of rows (or full extent for small / odd row counts).
    max_block_rows = max(
        sub_mult, (target_block_bytes // (lanes * itemsize)) // sub_mult * sub_mult
    )
    if rows % sub_mult != 0 or rows <= max_block_rows:
        block_rows = rows  # full-extent block along rows
    else:
        block_rows = sub_mult
        d = max_block_rows
        while d >= sub_mult:
            if rows % d == 0:
                block_rows = d
                break
            d -= sub_mult
    grid = (rows // block_rows,)

    # Scalars computed once on the scalar path: [beta, 1/beta].
    log_beta_f32 = jnp.asarray(log_beta, dtype=jnp.float32)
    scalars = jnp.stack(
        [jnp.exp(log_beta_f32), jnp.exp(-log_beta_f32)]
    ).reshape(1, 2)

    out2d = pl.pallas_call(
        _learned_softplus_kernel,
        out_shape=jax.ShapeDtypeStruct((rows, lanes), dtype),
        grid_spec=pltpu.PrefetchScalarGridSpec(
            num_scalar_prefetch=0,
            grid=grid,
            in_specs=[
                pl.BlockSpec((1, 2), lambda i: (0, 0),
                             memory_space=pltpu.SMEM),
                pl.BlockSpec((block_rows, lanes), lambda i: (i, 0)),
            ],
            out_specs=pl.BlockSpec((block_rows, lanes), lambda i: (i, 0)),
        ),
        compiler_params=pltpu.CompilerParams(
            dimension_semantics=("parallel",)),
    )(scalars, x2d)

    out = out2d.reshape(-1)
    if padded_n != n:
        out = out[:n]
    return out.reshape(orig_shape)


def learned_softplus_ref(x, log_beta):
    beta = jnp.exp(log_beta)
    beta_x = beta * x
    return jnp.where(beta_x < 20.0, jnp.log1p(jnp.exp(beta_x)) / beta, x)


if __name__ == "__main__":
    key = jax.random.PRNGKey(0)
    # Module __init__: log_beta = log(init_beta); use a non-trivial beta.
    init_beta = 1.5
    log_beta = jnp.log(jnp.float32(init_beta))

    # NCHW input, small shapes; scale up so some lanes hit the
    # beta*x >= 20 branch as well.
    x = jax.random.normal(key, (2, 4, 16, 16), dtype=jnp.float32) * 15.0

    out = learned_softplus(x, log_beta)
    jax.block_until_ready(out)

    ref = learned_softplus_ref(x, log_beta)
    assert out.shape == x.shape and out.dtype == x.dtype
    assert jnp.allclose(out, ref, atol=1e-5, rtol=1e-5), "mismatch vs reference"

    print("KERNEL_OK")
</pallas_src>

<mosaic_0001>
module attributes {stable_mosaic.version = 11 : i64} {
  func.func @_learned_softplus_kernel(%arg0: i32, %arg1: memref<1x2xf32, #tpu.memory_space<smem>>, %arg2: memref<8x256xf32, #tpu.memory_space<vmem>>, %arg3: memref<8x256xf32, #tpu.memory_space<vmem>>) attributes {dimension_semantics = [#tpu.dimension_semantics<parallel>], iteration_bounds = array<i64: 1>, scalar_prefetch = 0 : i64, scratch_operands = 0 : i64, tpu.core_type = #tpu.core_type<tc>, window_params = [{transform_indices = @transform_0, window_bounds = array<i64: 1, 2>}, {transform_indices = @transform_1, window_bounds = array<i64: 8, 256>}, {transform_indices = @transform_2, window_bounds = array<i64: 8, 256>}]} {
    %c0 = arith.constant 0 : index
    %c0_0 = arith.constant 0 : index
    %0 = memref.load %arg1[%c0, %c0_0] : memref<1x2xf32, #tpu.memory_space<smem>>
    %c0_1 = arith.constant 0 : index
    %c1 = arith.constant 1 : index
    %1 = memref.load %arg1[%c0_1, %c1] : memref<1x2xf32, #tpu.memory_space<smem>>
    %c0_2 = arith.constant 0 : index
    %c0_3 = arith.constant 0 : index
    %2 = vector.load %arg2[%c0_2, %c0_3] : memref<8x256xf32, #tpu.memory_space<vmem>>, vector<8x256xf32>
    %3 = vector.broadcast %0 : f32 to vector<8x256xf32>
    %4 = arith.mulf %3, %2 : vector<8x256xf32>
    %5 = math.exp %4 : vector<8x256xf32>
    %6 = math.log1p %5 : vector<8x256xf32>
    %7 = vector.broadcast %1 : f32 to vector<8x256xf32>
    %8 = arith.mulf %6, %7 : vector<8x256xf32>
    %cst = arith.constant 2.000000e+01 : f32
    %9 = vector.broadcast %cst : f32 to vector<8x256xf32>
    %10 = arith.cmpf olt, %4, %9 : vector<8x256xf32>
    %11 = arith.select %10, %8, %2 : vector<8x256xi1>, vector<8x256xf32>
    %c0_4 = arith.constant 0 : index
    %c0_5 = arith.constant 0 : index
    %12 = vector.load %arg3[%c0_4, %c0_5] : memref<8x256xf32, #tpu.memory_space<vmem>>, vector<8x256xf32>
    tpu.vector_store %arg3[%c0_4, %c0_5], %11 {strides = array<i32>} : memref<8x256xf32, #tpu.memory_space<vmem>>, vector<8x256xf32>,
    return
  }
  func.func @transform_0(%arg0: i32) -> (i32, i32) {
    %c0_i32 = arith.constant 0 : i32
    %c0_i32_0 = arith.constant 0 : i32
    %c0_i32_1 = arith.constant 0 : i32
    return %c0_i32, %c0_i32_0 : i32, i32
  }
  func.func @transform_1(%arg0: i32) -> (i32, i32) {
    %c0_i32 = arith.constant 0 : i32
    %c0_i32_0 = arith.constant 0 : i32
    return %arg0, %c0_i32 : i32, i32
  }
  func.func @transform_2(%arg0: i32) -> (i32, i32) {
    %c0_i32 = arith.constant 0 : i32
    %c0_i32_0 = arith.constant 0 : i32
    return %arg0, %c0_i32 : i32, i32
  }
}

</mosaic_0001>

<bundles_post_ra>
// kernel: tpu_custom_call.1
= control target key start
LH: loop header
LB: loop body
LE: loop exit
PB: predicated region body
PF: predicated region fallthrough
CT: control target
= control target key end

     0   :  { %7 = vsyncpa [#allocation5], 0  ;;  %s215_s0 = inlined_call_operand.hbm [shape: f32[1,2], index: 0, kind: input, shape index: {}]   ;;  %s216_s1 = inlined_call_operand.hbm [shape: f32[8,256], index: 1, kind: input, shape index: {}]   ;;  %s217_s2 = inlined_call_operand.hbm [shape: f32[8,256], index: 2, kind: output, shape index: {}]  }
   0x1   :  { %8 = vsyncpa [#allocation3], 0 }
   0x2   :  { %9 = vsyncpa [#allocation4], 0  ;;  %s101_s11 = scalar_lea.hbm %s215_s0, 16 }
   0x3   :  { %p102_p0 = scmp.ne.s32.totalorder %s215_s0, %s101_s11  ;;  %p105_p1 = scmp.lt.u32.totalorder %s101_s11, %s215_s0 }
   0x5   :  { %p107_p2 = pnand %p105_p1, %p102_p0 }
   0x7   :  { %110 = shalt.err (!%p107_p2)
}
   0x8   :  { %s161_s16 = smov [#allocation2]   ;;  %s162_s19 = smov [#allocation6]  }
   0x9   :  { %17 = dma.hbm_to_smem %s215_s0, 16, %s161_s16, [#allocation5]  }
   0xa   :  { %s24_s20 = sshll.u32 %s162_s19, 4  ;;  %s111_s23 = scalar_lea.hbm %s216_s1, 256  ;;  %s25_s20 = int_to_ptr.vmem [resolvable:$true] %s24_s20 }
   0xb   :  { %p112_p3 = scmp.ne.s32.totalorder %s216_s1, %s111_s23  ;;  %p115_p4 = scmp.lt.u32.totalorder %s111_s23, %s216_s1 }
   0xd   :  { %p117_p5 = pnand %p115_p4, %p112_p3 }
   0xf   :  { %120 = shalt.err (!%p117_p5)
}
  0x10   :  { %s121_s28 = scalar_lea.vmem %s25_s20, 256  ;;  %p126_p7 = scmp.lt.s32.totalorder %s25_s20, %s25_s20 }
  0x11   :  { %p122_p6 = scmp.ne.s32.totalorder %s25_s20, %s121_s28  ;;  %p127_p8 = scmp.lt.s32.totalorder %s121_s28, %s121_s28 }
  0x13   :  { %p128_p9 = por %p127_p8, %p126_p7 }
  0x15   :  { %p129_p10 = pnand %p128_p9, %p122_p6 }
  0x17   :  { %132 = shalt.err (!%p129_p10)
}
  0x18   :  { %27 = dma.hbm_to_vmem [thread:$0]  %s216_s1, 256, %s25_s20, [#allocation3]  }
  0x19   :  { %155 = dma.done.wait [#allocation5], 16  }
  0x1a   :  { %156 = vsyncadd [#allocation5], 4294967280 }
  0x1b   :  { %157 = dma.done.wait [#allocation3], 256  }
  0x1c   :  { %158 = vsyncadd [#allocation3], 4294967040 }
  0x1d   :  { %34 = sfence }
  0x1e   :  { %s35_s30 = sld [smem:[#allocation2]]  ;;  %v37_v0 = vld [vmem:[#allocation6] sm:$0xff]  ;;  %v38_v1 = vld [vmem:[#allocation6 + $0x8] sm:$0xff]  ;;  %s89_s1 = sld [smem:[#allocation2 + $0x1]] }
  0x1f   :  { %s163_s3 = smov [#allocation7]  }
  0x20   :  { %s79_s4 = sshll.u32 %s163_s3, 4  ;;  %s80_s4 = int_to_ptr.vmem [resolvable:$true] %s79_s4 }
  0x21   :  { %s133_s5 = scalar_lea.vmem %s80_s4, 256  ;;  %p138_p12 = scmp.lt.s32.totalorder %s80_s4, %s80_s4 }
  0x22   :  { %p134_p11 = scmp.ne.s32.totalorder %s80_s4, %s133_s5  ;;  %p139_p13 = scmp.lt.s32.totalorder %s133_s5, %s133_s5 }
  0x24   :  { %v39_v2 = vstv %s35_s30  ;;  %v64_v22 = vstv %s89_s1  ;;  %p140_p0 = por %p139_p13, %p138_p12 }
  0x25   :  { %v40_v3 = vmul.f32 %v39_v2, %v37_v0  ;;  %v41_v4 = vmul.f32 %v39_v2, %v38_v1 }
  0x26   :  { %p141_p1 = pnand %p140_p0, %p134_p11 }
  0x27   :  { %v42_v5 = vmul.f32 1.442695, %v40_v3  ;;  %v44_v6 = vmul.f32 1.442695, %v41_v4  ;;  %vm67_vm2 = vcmp.lt.f32.partialorder %v40_v3, 20.0  ;;  %vm68_vm3 = vcmp.lt.f32.partialorder %v41_v4, 20.0 }
  0x29   :  { %93 = vpow2.f32 %v42_v5 }
  0x2a   :  { %95 = vpow2.f32 %v44_v6 }
  0x33   :  { %v94_v7 = vpop.eup %93 }
  0x34   :  { %v96_v8 = vpop.eup %95  ;;  %v46_v9 = vadd.f32 1.0, %v94_v7  ;;  %v49_v11 = vmul.f32 -0.5, %v94_v7  ;;  %v52_v14 = vand.u32 2147483647, %v94_v7 }
  0x35   :  { %v55_v10 = vadd.f32 1.0, %v96_v8  ;;  %v58_v12 = vmul.f32 -0.5, %v96_v8  ;;  %v61_v16 = vand.u32 2147483647, %v96_v8 }
  0x36   :  { %97 = vlog2.f32 %v46_v9  ;;  %v50_v13 = vadd.f32 1.0, %v49_v11  ;;  %vm53_vm0 = vcmp.lt.f32.partialorder %v52_v14, 0.0004427343 }
  0x37   :  { %99 = vlog2.f32 %v55_v10  ;;  %v59_v15 = vadd.f32 1.0, %v58_v12  ;;  %vm62_vm1 = vcmp.lt.f32.partialorder %v61_v16, 0.0004427343 }
  0x38   :  { %v51_v17 = vmul.f32 %v94_v7, %v50_v13 }
  0x39   :  { %v60_v19 = vmul.f32 %v96_v8, %v59_v15 }
  0x40   :  { %v98_v18 = vpop.eup %97 }
  0x41   :  { %v100_v20 = vpop.eup %99  ;;  %v48_v21 = vmul.f32 0.6931472, %v98_v18 }
  0x42   :  { %v57_v23 = vmul.f32 0.6931472, %v100_v20 }
  0x43   :  { %v54_v24 = vsel %vm53_vm0, %v51_v17, %v48_v21 }
  0x44   :  { %v65_v25 = vmul.f32 %v64_v22, %v54_v24  ;;  %v63_v26 = vsel %vm62_vm1, %v60_v19, %v57_v23 }
  0x45   :  { %v66_v27 = vmul.f32 %v64_v22, %v63_v26 }
  0x46   :  { %v69_v28 = vsel %vm67_vm2, %v65_v25, %v37_v0 }
  0x47   :  { %71 = vst [vmem:[#allocation7] sm:$0xff] %v69_v28  ;;  %v70_v29 = vsel %vm68_vm3, %v66_v27, %v38_v1 }
  0x48   :  { %72 = vst [vmem:[#allocation7 + $0x8] sm:$0xff] %v70_v29 }
  0x49   :  { %144 = shalt.err (!%p141_p1)
}
  0x4a   :  { %s145_s8 = scalar_lea.hbm %s217_s2, 256 }
  0x4b   :  { %p146_p2 = scmp.ne.s32.totalorder %s217_s2, %s145_s8  ;;  %p149_p3 = scmp.lt.u32.totalorder %s145_s8, %s217_s2 }
  0x4d   :  { %p151_p4 = pnand %p149_p3, %p146_p2 }
  0x4f   :  { %154 = shalt.err (!%p151_p4)
}
  0x50   :  { %82 = dma.vmem_to_hbm [thread:$0]  %s80_s4, 256, %s217_s2, [#allocation4]  }
  0x51   :  { %159 = dma.done.wait [#allocation4], 256  }
  0x52   :  { %160 = vsyncadd [#allocation4], 4294967040 }
  0x53   :  { %86 = vsyncpa [#allocation3], 1 }
  0x54   :  { %87 = vsyncpa [#allocation4], 1 }
  0x55   :  { %88 = vsyncpa [#allocation5], 1 }

</bundles_post_ra>
